<compile_context>
chip_gen: v6e
topology: v6e:2x2x1
jax: 0.10.0
libtpu: 0.0.40
codegen_flags: <defaults>
</compile_context>

<pallas_src>
import jax
import jax.numpy as jnp
from jax.experimental import pallas as pl
from jax.experimental.pallas import tpu as pltpu


def _round_up(x, m):
    return ((x + m - 1) // m) * m


def _vmem_capacity_bytes():
    """Per-generation VMEM capacity (v5e/v6e: 128 MiB, v7x: 64 MiB per TC).
    Falls back to the most conservative value if the query is unavailable."""
    try:
        return int(pltpu.get_tpu_info().vmem_capacity_bytes)
    except Exception:
        return 64 * 1024 * 1024


def _fused_kernel(x_ref, wT_ref, b_ref, o_ref):
    """One grid step = one (image-block, pixel-tile) pair.

    x_ref:  (B_blk, C_in, TM)   pixel tile, pixels lane-dense
    wT_ref: (C_out, C_in)       ensemble-averaged weight, transposed
    b_ref:  (C_out, 1)          ensemble-averaged bias
    o_ref:  (B_blk, C_out, TM)  output tile (each written exactly once)
    """
    w = wT_ref[...]
    b = b_ref[...]
    # B_blk is small and static -> unrolled; each iteration is one lane-dense
    # (C_out, C_in) x (C_in, TM) MXU matmul plus a VPU bias add.
    for i in range(x_ref.shape[0]):
        y = jnp.dot(w, x_ref[i], preferred_element_type=jnp.float32)
        o_ref[i] = y + b


def ensemble_forward(image_nchw, weights, biases):
    """image_nchw: (N, C_in, H, W) f32
       weights:    (n_models, C_in, C_out) f32
       biases:     (n_models, C_out) f32
       returns:    (N, C_out, H, W) f32  == mean_i(conv1x1_i(image))
    """
    n_models, c_in, c_out = weights.shape
    n, c, h, w = image_nchw.shape
    assert c == c_in
    hw = h * w

    # Sublane-padded channel counts (VMEM pads the second-minor dim to 8).
    c_in8 = _round_up(c_in, 8)
    c_out8 = _round_up(c_out, 8)

    vmem_cap = _vmem_capacity_bytes()
    # ~45% of VMEM for the double-buffered streaming tiles (x + out), leaving
    # headroom for weight/bias blocks, semaphores and compiler scratch.
    stream_budget = (vmem_cap * 45) // 100

    def lane_cap(rows):
        # bytes per lane column = 2 (double buffer) * rows (sublane-padded) * 4B
        cap = stream_budget // (2 * rows * 4)
        return (cap // 128) * 128

    hw_pad = _round_up(hw, 128)

    # Small problems: pull the whole batch into the block to cut grid steps.
    total_bytes = 4 * n * hw_pad * (c_in8 + c_out8)
    merge_batch = total_bytes <= (8 << 20) and lane_cap(n * (c_in8 + c_out8)) >= 128

    if merge_batch:
        b_blk, n_b_steps = n, 1
        cap = lane_cap(n * (c_in8 + c_out8))
    else:
        b_blk, n_b_steps = 1, n
        cap = max(lane_cap(c_in8 + c_out8), 128)

    tile_m = min(hw_pad, cap)
    n_tiles = pl.cdiv(hw_pad, tile_m)
    # Re-balance so every tile is full-size (unmasked lane-dense stores).
    tile_m = _round_up(pl.cdiv(hw_pad, n_tiles), 128)

    # v7x has 2 TensorCores: keep >=2 parallel steps when it costs no extra
    # padding (on single-TC v5e/v6e the extra step is a negligible ~0.35us).
    if n_b_steps * n_tiles == 1 and hw_pad >= 256 and hw_pad % 256 == 0:
        n_tiles = 2
        tile_m = hw_pad // 2

    hw_total = n_tiles * tile_m

    # Fold the ensemble (exact for linear members): tiny glue ops in plain JAX.
    w_mean_t = jnp.mean(weights, axis=0).T                 # (C_out, C_in)
    b_mean = jnp.mean(biases, axis=0).reshape(c_out, 1)    # (C_out, 1)

    # NCHW -> (N, C_in, H*W): pure reshape (pixels on the lane axis); pad the
    # pixel axis so every tile is full.
    x3d = image_nchw.reshape(n, c_in, hw)
    if hw_total != hw:
        x3d = jnp.pad(x3d, ((0, 0), (0, 0), (0, hw_total - hw)))

    cost = pl.CostEstimate(
        flops=2 * n * hw_total * c_in * c_out,
        transcendentals=0,
        bytes_accessed=4 * (n * hw_total * (c_in + c_out) + c_in * c_out + c_out),
    )

    out3d = pl.pallas_call(
        _fused_kernel,
        out_shape=jax.ShapeDtypeStruct((n, c_out, hw_total), jnp.float32),
        grid_spec=pltpu.PrefetchScalarGridSpec(
            num_scalar_prefetch=0,
            grid=(n_b_steps, n_tiles),
            in_specs=[
                # pixel tile (batch block x channels x lane-dense pixels)
                pl.BlockSpec((b_blk, c_in, tile_m), lambda bi, j: (bi, 0, j)),
                # averaged weight / bias: constant index -> resident, DMA'd once
                pl.BlockSpec((c_out, c_in), lambda bi, j: (0, 0)),
                pl.BlockSpec((c_out, 1), lambda bi, j: (0, 0)),
            ],
            out_specs=pl.BlockSpec((b_blk, c_out, tile_m), lambda bi, j: (bi, 0, j)),
        ),
        compiler_params=pltpu.CompilerParams(
            dimension_semantics=("parallel", "parallel"),
            vmem_limit_bytes=(vmem_cap * 9) // 10,
        ),
        cost_estimate=cost,
    )(x3d, w_mean_t, b_mean)

    if hw_total != hw:
        out3d = out3d[..., :hw]
    # (N, C_out, H*W) -> NCHW: pure reshape.
    return out3d.reshape(n, c_out, h, w)


def _reference(image_nchw, weights, biases):
    """Plain-JAX reference matching the PyTorch ensemble semantics
    (explicit per-member forward, then mean)."""
    x = jnp.transpose(image_nchw, (0, 2, 3, 1))  # NHWC
    outs = []
    for i in range(weights.shape[0]):
        y = jnp.einsum("nhwc,cd->nhwd", x, weights[i]) + biases[i]
        outs.append(y[None])
    mean = jnp.mean(jnp.concatenate(outs, axis=0), axis=0)
    return jnp.transpose(mean, (0, 3, 1, 2))


if __name__ == "__main__":
    key = jax.random.PRNGKey(0)
    k_img, k_w, k_b = jax.random.split(key, 3)

    n_models = 3          # ensemble size (len(weight_files))
    N, C_in, H, W = 2, 4, 16, 16
    C_out = 8

    image = jax.random.normal(k_img, (N, C_in, H, W), dtype=jnp.float32)
    # Deterministic synthetic "checkpoints" for each ensemble member.
    weights = 0.1 * jax.random.normal(k_w, (n_models, C_in, C_out), dtype=jnp.float32)
    biases = 0.1 * jax.random.normal(k_b, (n_models, C_out), dtype=jnp.float32)

    out = ensemble_forward(image, weights, biases)
    out = jax.block_until_ready(out)

    ref = _reference(image, weights, biases)
    assert out.shape == (N, C_out, H, W)
    assert jnp.allclose(out, ref, atol=1e-5, rtol=1e-5)

    print("KERNEL_OK")
</pallas_src>

<mosaic_0001>
module attributes {stable_mosaic.version = 11 : i64} {
  func.func @_fused_kernel(%arg0: i32, %arg1: i32, %arg2: memref<2x4x128xf32, #tpu.memory_space<vmem>>, %arg3: memref<8x4xf32, #tpu.memory_space<vmem>>, %arg4: memref<8x1xf32, #tpu.memory_space<vmem>>, %arg5: memref<2x8x128xf32, #tpu.memory_space<vmem>>) attributes {dimension_semantics = [#tpu.dimension_semantics<parallel>, #tpu.dimension_semantics<parallel>], iteration_bounds = array<i64: 1, 2>, scalar_prefetch = 0 : i64, scratch_operands = 0 : i64, tpu.core_type = #tpu.core_type<tc>, window_params = [{transform_indices = @transform_0, window_bounds = array<i64: 2, 4, 128>}, {pipeline_mode = #tpu.pipeline_mode<synchronous>, transform_indices = @transform_1, window_bounds = array<i64: 8, 4>}, {pipeline_mode = #tpu.pipeline_mode<synchronous>, transform_indices = @transform_2, window_bounds = array<i64: 8, 1>}, {transform_indices = @transform_3, window_bounds = array<i64: 2, 8, 128>}]} {
    %c0 = arith.constant 0 : index
    %c0_0 = arith.constant 0 : index
    %0 = vector.load %arg3[%c0, %c0_0] : memref<8x4xf32, #tpu.memory_space<vmem>>, vector<8x4xf32>
    %c0_1 = arith.constant 0 : index
    %c0_2 = arith.constant 0 : index
    %1 = vector.load %arg4[%c0_1, %c0_2] : memref<8x1xf32, #tpu.memory_space<vmem>>, vector<8x1xf32>
    %c0_3 = arith.constant 0 : index
    %c0_4 = arith.constant 0 : index
    %c0_5 = arith.constant 0 : index
    %2 = vector.load %arg2[%c0_3, %c0_4, %c0_5] : memref<2x4x128xf32, #tpu.memory_space<vmem>>, vector<1x4x128xf32>
    %3 = vector.shape_cast %2 : vector<1x4x128xf32> to vector<4x128xf32>
    %cst = arith.constant dense<0.000000e+00> : vector<8x128xf32>
    %4 = tpu.matmul %0, %3, %cst {dimension_numbers = #tpu.dot_dimension_numbers<[1], [0], [0], [1], [0, 0, 1, 1], [], []>} : vector<8x4xf32>, vector<4x128xf32>, vector<8x128xf32> -> vector<8x128xf32>
    %5 = vector.broadcast %1 : vector<8x1xf32> to vector<8x128xf32>
    %6 = arith.addf %4, %5 : vector<8x128xf32>
    %c0_6 = arith.constant 0 : index
    %c0_7 = arith.constant 0 : index
    %c0_8 = arith.constant 0 : index
    %7 = vector.load %arg5[%c0_6, %c0_7, %c0_8] : memref<2x8x128xf32, #tpu.memory_space<vmem>>, vector<1x8x128xf32>
    %8 = vector.shape_cast %7 : vector<1x8x128xf32> to vector<8x128xf32>
    %9 = vector.shape_cast %6 : vector<8x128xf32> to vector<1x8x128xf32>
    tpu.vector_store %arg5[%c0_6, %c0_7, %c0_8], %9 {strides = array<i32>} : memref<2x8x128xf32, #tpu.memory_space<vmem>>, vector<1x8x128xf32>,
    %c1 = arith.constant 1 : index
    %c0_9 = arith.constant 0 : index
    %c0_10 = arith.constant 0 : index
    %10 = vector.load %arg2[%c1, %c0_9, %c0_10] : memref<2x4x128xf32, #tpu.memory_space<vmem>>, vector<1x4x128xf32>
    %11 = vector.shape_cast %10 : vector<1x4x128xf32> to vector<4x128xf32>
    %cst_11 = arith.constant dense<0.000000e+00> : vector<8x128xf32>
    %12 = tpu.matmul %0, %11, %cst_11 {dimension_numbers = #tpu.dot_dimension_numbers<[1], [0], [0], [1], [0, 0, 1, 1], [], []>} : vector<8x4xf32>, vector<4x128xf32>, vector<8x128xf32> -> vector<8x128xf32>
    %13 = vector.broadcast %1 : vector<8x1xf32> to vector<8x128xf32>
    %14 = arith.addf %12, %13 : vector<8x128xf32>
    %c1_12 = arith.constant 1 : index
    %c0_13 = arith.constant 0 : index
    %c0_14 = arith.constant 0 : index
    %15 = vector.load %arg5[%c1_12, %c0_13, %c0_14] : memref<2x8x128xf32, #tpu.memory_space<vmem>>, vector<1x8x128xf32>
    %16 = vector.shape_cast %15 : vector<1x8x128xf32> to vector<8x128xf32>
    %17 = vector.shape_cast %14 : vector<8x128xf32> to vector<1x8x128xf32>
    tpu.vector_store %arg5[%c1_12, %c0_13, %c0_14], %17 {strides = array<i32>} : memref<2x8x128xf32, #tpu.memory_space<vmem>>, vector<1x8x128xf32>,
    return
  }
  func.func @transform_0(%arg0: i32, %arg1: i32) -> (i32, i32, i32) {
    %c0_i32 = arith.constant 0 : i32
    %c0_i32_0 = arith.constant 0 : i32
    return %arg0, %c0_i32, %arg1 : i32, i32, i32
  }
  func.func @transform_1(%arg0: i32, %arg1: i32) -> (i32, i32) {
    %c0_i32 = arith.constant 0 : i32
    %c0_i32_0 = arith.constant 0 : i32
    %c0_i32_1 = arith.constant 0 : i32
    return %c0_i32, %c0_i32_0 : i32, i32
  }
  func.func @transform_2(%arg0: i32, %arg1: i32) -> (i32, i32) {
    %c0_i32 = arith.constant 0 : i32
    %c0_i32_0 = arith.constant 0 : i32
    %c0_i32_1 = arith.constant 0 : i32
    return %c0_i32, %c0_i32_0 : i32, i32
  }
  func.func @transform_3(%arg0: i32, %arg1: i32) -> (i32, i32, i32) {
    %c0_i32 = arith.constant 0 : i32
    %c0_i32_0 = arith.constant 0 : i32
    return %arg0, %c0_i32, %arg1 : i32, i32, i32
  }
}

</mosaic_0001>

<bundles_post_ra>
// kernel: tpu_custom_call.1
= control target key start
LH: loop header
LB: loop body
LE: loop exit
PB: predicated region body
PF: predicated region fallthrough
CT: control target
= control target key end

     0   :  { %8 = vsyncpa [#allocation4], 0  ;;  %s826_s0 = inlined_call_operand.vmem [shape: f32[2,4,256], index: 0, kind: input, shape index: {}]   ;;  %s827_s1 = inlined_call_operand.vmem [shape: f32[8,4], index: 1, kind: input, shape index: {}]   ;;  %s828_s2 = inlined_call_operand.vmem [shape: f32[8,1], index: 2, kind: input, shape index: {}]   ;;  %s829_s3 = inlined_call_operand.hbm [shape: f32[2,8,256], index: 3, kind: output, shape index: {}]  }
   0x1   :  { %10 = vsyncpa [#allocation4 + $0x1], 0  ;;  %s697_s12 = smov 0   ;;  %s699_s13 = smov 0  }
   0x2   :  { %s701_s14 = smov 0   ;;  %s703_s15 = smov 0  }
   0x3   :  { %s705_s16 = smov 0   ;;  %s707_s17 = smov 0  }
   0x4 LB: > { %s497_s18 = sadd.s32 4294967295, %s668_s17   ;;  %s498_s19 = sadd.s32 4294967294, %s668_s17   ;;  %s668_s17 = sphi %s707_s17, %s16_s17   ;;  %s664_s16 = sphi %s705_s16, %s836_s16   ;;  %s660_s15 = sphi %s703_s15, %s835_s15   ;;  %s656_s14 = sphi %s701_s14, %s834_s14   ;;  %s652_s13 = sphi %s699_s13, %s833_s13   ;;  %s648_s12 = sphi %s697_s12, %s832_s12  }
   0x5   : > { %s25_s20 = sadd.s32 1, %s664_s16  ;;  %s37_s21 = sadd.s32 1, %s656_s14 }
   0x6   : > { %p26_p0 = scmp.ge.s32.totalorder %s25_s20, 2  ;;  %p44_p1 = scmp.ne.s32.totalorder %s656_s14, %s652_s13 }
   0x7   : > { %p45_p2 = scmp.eq.s32.totalorder %s668_s17, 0  ;;  %p118_p3 = scmp.eq.s32.totalorder %s497_s18, 1 }
   0x8   : > { %s838_s20 = smov (%p26_p0, %s25_s20), 0  ;;  %p123_p6 = scmp.ne.s32.totalorder %s652_s13, %s648_s12 }
   0x9   : > { %p46_p4 = por %p45_p2, %p44_p1  ;;  %p736_p5 = por %p118_p3, %p44_p1 }
   0xa   : > { %s33_s23 = ssub.s32 %s664_s16, %s838_s20  ;;  %p124_p8 = scmp.eq.s32.totalorder %s498_s19, 1 }
   0xb   : > { %p35_p7 = scmp.eq.s32.totalorder %s33_s23, 0  ;;  %p500_p10 = scmp.ge.s32.totalorder %s668_s17, 2 }
   0xc   : > { %p747_p9 = por %p124_p8, %p123_p6 }
   0xd   : > { %s745_s24 = scalar_select %p35_p7, %s656_s14, %s37_s21  }
   0xe   : > { %146 = sbr.rel (%p500_p10) target bundleno = 24 (0x18), region = 24 }
  0x13   : > { %149 = sbr.rel (!%p46_p4) target bundleno = 24 (0x18), region = 28  ;;  %s151_s26 = sand.u32 (%p46_p4), 1, %s656_s14  }
  0x14   : > { %s502_s27 = sshll.u32 (%p46_p4), %s664_s16, 2  ;;  %s501_s28 = sshll.u32 (%p46_p4), %s151_s26, 3 }
  0x15   : > { %s158_s4 = scalar_lea.vmem (%p46_p4), %s826_s0, %s502_s27  ;;  %s153_s5 = scalar_lea.vmem (%p46_p4), [#allocation2], %s501_s28 }
  0x16   : > { %v175_v0 = vld [vmem:[%s158_s4] sm:$0xf] (%p46_p4)  ;;  %v177_v1 = vld [vmem:[%s158_s4 + $0x8] sm:$0xf] (%p46_p4) }
  0x17   : > { %176 = vst [vmem:[%s153_s5] sm:$0xf] (%p46_p4), %v175_v0  ;;  %178 = vst [vmem:[%s153_s5 + $0x4] sm:$0xf] (%p46_p4), %v177_v1 }
  0x18 PF: > { %p503_p11 = scmp.ge.s32.totalorder %s668_s17, 1  ;;  %p205_p12 = scmp.lt.s32.totalorder %s668_s17, 3 }
  0x1a   : > { %p206_p13 = pnand %p503_p11, %p205_p12 }
  0x1b   : > { %s762_s6 = sand.u32 (!%p206_p13), 1, %s652_s13   ;;  %s513_s26 = sshll.u32 (!%p206_p13), %s660_s15, 7 }
  0x1c   : > { %209 = sbr.rel (%p206_p13) target bundleno = 248 (0xf8), region = 69  ;;  %s504_s7 = sshll.u32 (!%p206_p13), %s762_s6, 3 }
  0x1d   : > { %s214_s10 = scalar_lea.vmem (!%p206_p13), [#allocation2], %s504_s7  ;;  %s505_s19 = sshll.u32 (!%p206_p13), %s762_s6, 4 }
  0x1e   : > { %s234_s21 = scalar_lea.vmem (!%p206_p13), [#allocation3], %s505_s19  ;;  %s778_s29 = scalar_lea.hbm (!%p206_p13), %s829_s3, %s513_s26 }
  0x1f   : > { %s417_s23 = sshll.u32 (!%p206_p13), %s234_s21, 4  ;;  %s402_s15 = scalar_lea.sflag (!%p206_p13), [#allocation4], %s762_s6  ;;  %s773_s23 = int_to_ptr.vmem [resolvable:$true] %s417_s23 }
  0x20   : > { %s592_s30 = scalar_lea.vmem (!%p206_p13), %s773_s23, 256  ;;  %s673_s4 = smov (!%p206_p13), [#allocation3]  }
  0x21   : > { %v670_v2 = vmov 0.0   ;;  %vm249_vm0 = vcmask 1043456   ;;  %vm671_vm1 = vmmov 0   ;;  %v237_v3 = vld [vmem:[%s827_s1] sm:$0xff]  ;;  %vm245_vm2 = vcmask 31744   ;;  %p593_p0 = scmp.ne.s32.totalorder %s773_s23, %s592_s30  ;;  %s596_s5 = sshll.u32 %s673_s4, 4  ;;  %s597_s5 = int_to_ptr.vmem [resolvable:$false] %s596_s5 }
  0x22   : > { %520 = vmatprep.subr.mxu0 %v670_v2  ;;  %525 = vmatprep.subr.mxu1 %v670_v2  ;;  %v239_v4 = vld [vmem:[%s214_s10] sm:$0xf]  ;;  %v508_v5 = vld [vmem:[%s214_s10 + $0x4] sm:$0xf]  ;;  %v672_v6 = vmov 0   ;;  %s598_s7 = scalar_lea.vmem %s597_s5, 512  ;;  %p599_p3 = scmp.lt.s32.totalorder %s773_s23, %s597_s5 }
  0x23   : > { %522 = vmatprep.mubr.msk.f32.mxu0 %vm671_vm1, %v670_v2  ;;  %527 = vmatprep.mubr.msk.f32.mxu1 %vm671_vm1, %v670_v2  ;;  %v238_v7 = vld [vmem:[%s828_s2] sm:$0xff]  ;;  %p594_p1 = pnand %p593_p0, %p736_p5  ;;  %p600_p4 = scmp.lt.s32.totalorder %s598_s7, %s592_s30 }
  0x24   : > { %591 = vset.pattern.permute.xlu0 %v672_v6  ;;  %521 = vmatpush3.msk.msra.mxu0 %vm249_vm0, %v239_v4 }
  0x25   : > { %526 = vmatpush3.msk.msra.mxu1 %vm249_vm0, %v508_v5  ;;  %523 = vmatmul.mubr.msk.f32.vlgmr.msra.gmra.mxu0 %vm245_vm2, %v237_v3  ;;  %p595_p2 = pneg %p594_p1  ;;  %p601_p6 = por %p600_p4, %p599_p3 }
  0x26   : > { %528 = vmatmul.mubr.msk.f32.vlgmr.msra.gmra.mxu1 %vm245_vm2, %v237_v3  ;;  %242 = vperm.xlu0 %591, %v238_v7  }
  0x27   : > { %p602_p7 = pnand %p601_p6, %p595_p2 }
  0xa1   : > { %v243_v8 = vpop.permute.xlu0 %242 }
  0xe5   : > { %v319_v9 = vpop.f32.mrf.mxu0 }
  0xe6   : > { %v395_v10 = vpop.f32.mrf.mxu1  ;;  %v320_v11 = vadd.f32 %v319_v9, %v243_v8 }
  0xe7   : > { %v396_v12 = vadd.f32 %v395_v10, %v243_v8  ;;  %v524_v13 = vpop.f32.mrf.mxu0 }
  0xe8   : > { %v529_v14 = vpop.f32.mrf.mxu1  ;;  %323 = vst [vmem:[%s234_s21] sm:$0xff] %v320_v11 }
  0xe9   : > { %511 = vst [vmem:[%s234_s21 + $0x8] sm:$0xff] %v396_v12 }
  0xea   : > { %605 = shalt.err (!%p602_p7)
}
  0xeb   : > { %s606_s8 = scalar_lea.hbm %s778_s29, 256  ;;  %s610_s11 = scalar_lea.hbm %s829_s3, 512 }
  0xec   : > { %p607_p8 = scmp.ne.s32.totalorder %s778_s29, %s606_s8  ;;  %p611_p13 = scmp.lt.s32.totalorder %s778_s29, %s829_s3 }
  0xed   : > { %p612_p0 = scmp.lt.s32.totalorder %s610_s11, %s606_s8 }
  0xee   : > { %p608_p11 = pnand %p607_p8, %p736_p5 }
  0xef   : > { %p613_p1 = por %p612_p0, %p611_p13 }
  0xf0   : > { %p609_p12 = pneg %p608_p11 }
  0xf2   : > { %p614_p2 = pnand %p613_p1, %p609_p12 }
  0xf4   : > { %617 = shalt.err (!%p614_p2)
}
  0xf5   : > { %s674_s21 = smov 128   ;;  %s675_s26 = smov 256  }
  0xf6   : > { %s676_s27 = smov 8  }
  0xf7   : > { %530 = dma.vmem_to_hbm [thread:$0]  (%p736_p5), %s773_s23, 256, %s778_s29, %s402_s15, %s674_s21, %s675_s26, %s676_s27  }
  0xf8 PF: > { %s432_s28 = sand.u32 1, %s648_s12   ;;  %p533_p3 = pnand %p500_p10, %p747_p9 }
  0xf9   : > { %s433_s30 = scalar_lea.sflag [#allocation4], %s432_s28 }
  0xfa   : > { %p534_p4 = pneg %p533_p3 }
  0xfc   : > { %643 = dma.done.wait (%p534_p4), %s433_s30, 256  }
  0xfd   : > { %645 = vsyncadd (%p534_p4), %s433_s30, 4294967040  ;;  %s16_s17 = sadd.s32 1, %s668_s17   ;;  %s832_s12 = smov %s652_s13 }
  0xfe   : > { %p13_p6 = scmp.ge.s32.totalorder %s16_s17, 4   ;;  %s833_s13 = smov %s656_s14 }
  0xff   : > { %s834_s14 = smov %s745_s24  ;;  %s835_s15 = smov %s664_s16 }
 0x100   : > { %s836_s16 = smov %s838_s20  ;;  %15 = sbr.rel (!%p13_p6) target bundleno = 4 (0x4), region = 115 }
 0x105   :  { %438 = vsyncpa [#allocation4], 1 }
 0x106   :  { %440 = vsyncpa [#allocation4 + $0x1], 1 }

</bundles_post_ra>
